<compile_context>
chip_gen: v5e
topology: v5e:2x2
jax: 0.10.0
libtpu: 0.0.40
codegen_flags: <defaults>
</compile_context>

<pallas_src>
import functools

import jax
import jax.numpy as jnp
from jax import lax
from jax.experimental import pallas as pl
from jax.experimental.pallas import tpu as pltpu

EPS = 1e-5          # torch.nn.BatchNorm1d default eps
LANE = 128          # TPU lane width; all feature dims padded to this
NEG_SLOPE = 0.01    # F.leaky_relu default


# ---------------------------------------------------------------------------
# Kernel: fused 4-layer GCN forward (BN already folded into W / b).
#   a_ref  : (N, N)        bf16  normalized adjacency D^-1/2 (A+I) D^-1/2
#   x_ref  : (N, 128)      f32   node features, zero-padded to 128 lanes
#   w_ref  : (4, 128, 128) bf16  per-layer (BN-folded) weights
#   b_ref  : (4, 128)      f32   per-layer (BN-folded) biases
#   out_ref: (N, 128)      f32   lane-dense output (sliced in the wrapper)
# ---------------------------------------------------------------------------
def gnn_kernel(a_ref, x_ref, w_ref, b_ref, out_ref):
    a_hat = a_ref[...]  # resident in VMEM across all 4 layers

    def gcn(x_f32, layer):
        # X @ W on the MXU: bf16 operands, f32 accumulate.
        h = jnp.dot(x_f32.astype(jnp.bfloat16), w_ref[layer],
                    preferred_element_type=jnp.float32)
        # Neighborhood aggregation A_hat @ (X W) + b.
        h = jnp.dot(a_hat, h.astype(jnp.bfloat16),
                    preferred_element_type=jnp.float32)
        return h + b_ref[layer, :]

    def block(x, layer):
        h = gcn(x, layer)
        h = jnp.where(h >= 0, h, NEG_SLOPE * h)   # leaky_relu in f32 (VPU)
        # TODO(synk): Dropout modeled in eval mode (identity); no random mask.
        return h + x                               # residual

    x = x_ref[...]
    x = block(x, 0)
    x = block(x, 1)
    x = block(x, 2)
    out_ref[...] = gcn(x, 3)


# ---------------------------------------------------------------------------
# Host-side preparation (done once for a static graph / fixed parameters).
# ---------------------------------------------------------------------------
def gcn_norm_adj(edge_index, num_nodes):
    """Dense D^-1/2 (A + I) D^-1/2 from edge_index (2, E); messages src->dst.
    Duplicate edges accumulate (scatter_add), matching PyG GCNConv."""
    src, dst = edge_index[0], edge_index[1]
    adj = jnp.zeros((num_nodes, num_nodes), jnp.float32)
    adj = adj.at[dst, src].add(1.0)
    adj = adj + jnp.eye(num_nodes, dtype=jnp.float32)   # self-loops
    deg = adj.sum(axis=1)
    dinv = jnp.where(deg > 0, lax.rsqrt(deg), 0.0)
    return dinv[:, None] * adj * dinv[None, :]


def _pad_to(x, rows, cols):
    return jnp.zeros((rows, cols), x.dtype).at[: x.shape[0], : x.shape[1]].set(x)


def prepare_params(params):
    """Fold eval-mode BatchNorm into the GCN weights/biases and pack them into
    lane-dense stacks: W_stack (4,128,128) bf16, b_stack (4,128) f32."""
    (w1, b1, g1, be1, m1, v1,
     w2, b2, g2, be2, m2, v2,
     w3, b3, g3, be3, m3, v3,
     w4, b4) = params

    def fold(w, b, g, be, m, v):
        scale = g * lax.rsqrt(v + EPS)          # (1, dout)
        return w * scale, (b - m) * scale + be

    w1f, b1f = fold(w1, b1, g1, be1, m1, v1)
    w2f, b2f = fold(w2, b2, g2, be2, m2, v2)
    w3f, b3f = fold(w3, b3, g3, be3, m3, v3)

    ws = [_pad_to(w, LANE, LANE) for w in (w1f, w2f, w3f, w4)]
    bs = [_pad_to(b, 1, LANE) for b in (b1f, b2f, b3f, b4)]
    w_stack = jnp.stack(ws).astype(jnp.bfloat16)               # (4, 128, 128)
    b_stack = jnp.concatenate(bs, axis=0).astype(jnp.float32)  # (4, 128)
    return w_stack, b_stack


@functools.partial(jax.jit, static_argnames=("output_dim",))
def gnn_forward(a_hat, x, w_stack, b_stack, *, output_dim):
    n = a_hat.shape[0]
    x_pad = _pad_to(x.astype(jnp.float32), n, LANE)
    a_bf16 = a_hat.astype(jnp.bfloat16)

    # Resident footprint (bytes), used to size the scoped VMEM limit.
    footprint = (a_bf16.size * 2 + x_pad.size * 4 + w_stack.size * 2
                 + b_stack.size * 4 + n * LANE * 4)
    vmem_limit = int(min(48 * 1024 * 1024,
                         max(16 * 1024 * 1024, 2 * footprint + (2 << 20))))

    vmem = pl.BlockSpec(memory_space=pltpu.MemorySpace.VMEM)
    out = pl.pallas_call(
        gnn_kernel,
        out_shape=jax.ShapeDtypeStruct((n, LANE), jnp.float32),
        in_specs=[vmem, vmem, vmem, vmem],
        out_specs=vmem,
        compiler_params=pltpu.CompilerParams(vmem_limit_bytes=vmem_limit),
    )(a_bf16, x_pad, w_stack, b_stack)
    return out[:, :output_dim]


def init_params(key, input_dim, hidden_dim, output_dim):
    """Deterministic synthetic parameters mirroring GNNModel.__init__ shapes."""
    ks = jax.random.split(key, 16)
    params = []
    dims = [(input_dim, hidden_dim), (hidden_dim, hidden_dim),
            (hidden_dim, hidden_dim), (hidden_dim, output_dim)]
    ki = 0
    for layer, (din, dout) in enumerate(dims):
        w = 0.1 * jax.random.normal(ks[ki], (din, dout), jnp.float32); ki += 1
        b = 0.01 * jax.random.normal(ks[ki], (1, dout), jnp.float32); ki += 1
        params += [w, b]
        if layer < 3:  # BatchNorm1d(hidden_dim) for bn1/bn2/bn3 (eval-mode stats)
            gamma = jax.random.uniform(ks[ki], (1, dout), jnp.float32, 0.5, 1.5); ki += 1
            beta = 0.1 * jax.random.normal(ks[ki], (1, dout), jnp.float32); ki += 1
            rmean = 0.1 * jax.random.normal(jax.random.fold_in(key, 100 + layer),
                                            (1, dout), jnp.float32)
            rvar = jax.random.uniform(jax.random.fold_in(key, 200 + layer),
                                      (1, dout), jnp.float32, 0.5, 1.5)
            params += [gamma, beta, rmean, rvar]
    return params


if __name__ == "__main__":
    # Residual connections require input_dim == hidden_dim.
    N, INPUT_DIM, HIDDEN_DIM, OUTPUT_DIM, E = 64, 32, 32, 16, 256

    key = jax.random.PRNGKey(0)
    kx, ke1, ke2, kp = jax.random.split(key, 4)

    x = jax.random.normal(kx, (N, INPUT_DIM), jnp.float32)
    # Random directed edges without self-loops.
    src = jax.random.randint(ke1, (E,), 0, N, jnp.int32)
    off = jax.random.randint(ke2, (E,), 1, N, jnp.int32)
    dst = (src + off) % N
    edge_index = jnp.stack([src, dst], axis=0)

    # Static graph + fixed parameters: amortize the O(N^2) normalization and
    # the BN folding / packing outside the per-call forward.
    a_hat = jax.block_until_ready(gcn_norm_adj(edge_index, N))
    raw_params = init_params(kp, INPUT_DIM, HIDDEN_DIM, OUTPUT_DIM)
    w_stack, b_stack = prepare_params(raw_params)

    out = gnn_forward(a_hat, x, w_stack, b_stack, output_dim=OUTPUT_DIM)
    jax.block_until_ready(out)
    assert out.shape == (N, OUTPUT_DIM) and out.dtype == jnp.float32
    assert bool(jnp.all(jnp.isfinite(out)))
    print("KERNEL_OK")
</pallas_src>

<mosaic_0001>
module attributes {stable_mosaic.version = 11 : i64} {
  func.func @gnn_kernel(%arg0: memref<64x64xbf16, #tpu.memory_space<vmem>>, %arg1: memref<64x128xf32, #tpu.memory_space<vmem>>, %arg2: memref<4x128x128xbf16, #tpu.memory_space<vmem>>, %arg3: memref<4x128xf32, #tpu.memory_space<vmem>>, %arg4: memref<64x128xf32, #tpu.memory_space<vmem>>) attributes {dimension_semantics = [], scalar_prefetch = 0 : i64, scratch_operands = 0 : i64, tpu.core_type = #tpu.core_type<tc>} {
    %c0 = arith.constant 0 : index
    %c0_0 = arith.constant 0 : index
    %0 = vector.load %arg0[%c0, %c0_0] : memref<64x64xbf16, #tpu.memory_space<vmem>>, vector<64x64xbf16>
    %c0_1 = arith.constant 0 : index
    %c0_2 = arith.constant 0 : index
    %1 = vector.load %arg1[%c0_1, %c0_2] : memref<64x128xf32, #tpu.memory_space<vmem>>, vector<64x128xf32>
    %2 = arith.truncf %1 : vector<64x128xf32> to vector<64x128xbf16>
    %c0_3 = arith.constant 0 : index
    %c0_4 = arith.constant 0 : index
    %c0_5 = arith.constant 0 : index
    %3 = vector.load %arg2[%c0_3, %c0_4, %c0_5] : memref<4x128x128xbf16, #tpu.memory_space<vmem>>, vector<1x128x128xbf16>
    %4 = vector.shape_cast %3 : vector<1x128x128xbf16> to vector<128x128xbf16>
    %cst = arith.constant dense<0.000000e+00> : vector<64x128xf32>
    %5 = tpu.matmul %2, %4, %cst {dimension_numbers = #tpu.dot_dimension_numbers<[1], [0], [0], [1], [0, 0, 1, 1], [], []>} : vector<64x128xbf16>, vector<128x128xbf16>, vector<64x128xf32> -> vector<64x128xf32>
    %6 = arith.truncf %5 : vector<64x128xf32> to vector<64x128xbf16>
    %cst_6 = arith.constant dense<0.000000e+00> : vector<64x128xf32>
    %7 = tpu.matmul %0, %6, %cst_6 {dimension_numbers = #tpu.dot_dimension_numbers<[1], [0], [0], [1], [0, 0, 1, 1], [], []>} : vector<64x64xbf16>, vector<64x128xbf16>, vector<64x128xf32> -> vector<64x128xf32>
    %c0_7 = arith.constant 0 : index
    %c0_8 = arith.constant 0 : index
    %8 = vector.load %arg3[%c0_7, %c0_8] : memref<4x128xf32, #tpu.memory_space<vmem>>, vector<1x128xf32>
    %9 = vector.shape_cast %8 : vector<1x128xf32> to vector<128xf32>
    %10 = vector.shape_cast %9 : vector<128xf32> to vector<1x128xf32>
    %11 = vector.broadcast %10 : vector<1x128xf32> to vector<64x128xf32>
    %12 = arith.addf %7, %11 : vector<64x128xf32>
    %cst_9 = arith.constant 0.000000e+00 : f32
    %13 = vector.broadcast %cst_9 : f32 to vector<64x128xf32>
    %14 = arith.cmpf oge, %12, %13 : vector<64x128xf32>
    %cst_10 = arith.constant 0.00999999977 : f32
    %15 = vector.broadcast %cst_10 : f32 to vector<64x128xf32>
    %16 = arith.mulf %15, %12 : vector<64x128xf32>
    %17 = arith.select %14, %12, %16 : vector<64x128xi1>, vector<64x128xf32>
    %18 = arith.addf %17, %1 : vector<64x128xf32>
    %19 = arith.truncf %18 : vector<64x128xf32> to vector<64x128xbf16>
    %c1 = arith.constant 1 : index
    %c0_11 = arith.constant 0 : index
    %c0_12 = arith.constant 0 : index
    %20 = vector.load %arg2[%c1, %c0_11, %c0_12] : memref<4x128x128xbf16, #tpu.memory_space<vmem>>, vector<1x128x128xbf16>
    %21 = vector.shape_cast %20 : vector<1x128x128xbf16> to vector<128x128xbf16>
    %cst_13 = arith.constant dense<0.000000e+00> : vector<64x128xf32>
    %22 = tpu.matmul %19, %21, %cst_13 {dimension_numbers = #tpu.dot_dimension_numbers<[1], [0], [0], [1], [0, 0, 1, 1], [], []>} : vector<64x128xbf16>, vector<128x128xbf16>, vector<64x128xf32> -> vector<64x128xf32>
    %23 = arith.truncf %22 : vector<64x128xf32> to vector<64x128xbf16>
    %cst_14 = arith.constant dense<0.000000e+00> : vector<64x128xf32>
    %24 = tpu.matmul %0, %23, %cst_14 {dimension_numbers = #tpu.dot_dimension_numbers<[1], [0], [0], [1], [0, 0, 1, 1], [], []>} : vector<64x64xbf16>, vector<64x128xbf16>, vector<64x128xf32> -> vector<64x128xf32>
    %c1_15 = arith.constant 1 : index
    %c0_16 = arith.constant 0 : index
    %25 = vector.load %arg3[%c1_15, %c0_16] : memref<4x128xf32, #tpu.memory_space<vmem>>, vector<1x128xf32>
    %26 = vector.shape_cast %25 : vector<1x128xf32> to vector<128xf32>
    %27 = vector.shape_cast %26 : vector<128xf32> to vector<1x128xf32>
    %28 = vector.broadcast %27 : vector<1x128xf32> to vector<64x128xf32>
    %29 = arith.addf %24, %28 : vector<64x128xf32>
    %cst_17 = arith.constant 0.000000e+00 : f32
    %30 = vector.broadcast %cst_17 : f32 to vector<64x128xf32>
    %31 = arith.cmpf oge, %29, %30 : vector<64x128xf32>
    %cst_18 = arith.constant 0.00999999977 : f32
    %32 = vector.broadcast %cst_18 : f32 to vector<64x128xf32>
    %33 = arith.mulf %32, %29 : vector<64x128xf32>
    %34 = arith.select %31, %29, %33 : vector<64x128xi1>, vector<64x128xf32>
    %35 = arith.addf %34, %18 : vector<64x128xf32>
    %36 = arith.truncf %35 : vector<64x128xf32> to vector<64x128xbf16>
    %c2 = arith.constant 2 : index
    %c0_19 = arith.constant 0 : index
    %c0_20 = arith.constant 0 : index
    %37 = vector.load %arg2[%c2, %c0_19, %c0_20] : memref<4x128x128xbf16, #tpu.memory_space<vmem>>, vector<1x128x128xbf16>
    %38 = vector.shape_cast %37 : vector<1x128x128xbf16> to vector<128x128xbf16>
    %cst_21 = arith.constant dense<0.000000e+00> : vector<64x128xf32>
    %39 = tpu.matmul %36, %38, %cst_21 {dimension_numbers = #tpu.dot_dimension_numbers<[1], [0], [0], [1], [0, 0, 1, 1], [], []>} : vector<64x128xbf16>, vector<128x128xbf16>, vector<64x128xf32> -> vector<64x128xf32>
    %40 = arith.truncf %39 : vector<64x128xf32> to vector<64x128xbf16>
    %cst_22 = arith.constant dense<0.000000e+00> : vector<64x128xf32>
    %41 = tpu.matmul %0, %40, %cst_22 {dimension_numbers = #tpu.dot_dimension_numbers<[1], [0], [0], [1], [0, 0, 1, 1], [], []>} : vector<64x64xbf16>, vector<64x128xbf16>, vector<64x128xf32> -> vector<64x128xf32>
    %c2_23 = arith.constant 2 : index
    %c0_24 = arith.constant 0 : index
    %42 = vector.load %arg3[%c2_23, %c0_24] : memref<4x128xf32, #tpu.memory_space<vmem>>, vector<1x128xf32>
    %43 = vector.shape_cast %42 : vector<1x128xf32> to vector<128xf32>
    %44 = vector.shape_cast %43 : vector<128xf32> to vector<1x128xf32>
    %45 = vector.broadcast %44 : vector<1x128xf32> to vector<64x128xf32>
    %46 = arith.addf %41, %45 : vector<64x128xf32>
    %cst_25 = arith.constant 0.000000e+00 : f32
    %47 = vector.broadcast %cst_25 : f32 to vector<64x128xf32>
    %48 = arith.cmpf oge, %46, %47 : vector<64x128xf32>
    %cst_26 = arith.constant 0.00999999977 : f32
    %49 = vector.broadcast %cst_26 : f32 to vector<64x128xf32>
    %50 = arith.mulf %49, %46 : vector<64x128xf32>
    %51 = arith.select %48, %46, %50 : vector<64x128xi1>, vector<64x128xf32>
    %52 = arith.addf %51, %35 : vector<64x128xf32>
    %53 = arith.truncf %52 : vector<64x128xf32> to vector<64x128xbf16>
    %c3 = arith.constant 3 : index
    %c0_27 = arith.constant 0 : index
    %c0_28 = arith.constant 0 : index
    %54 = vector.load %arg2[%c3, %c0_27, %c0_28] : memref<4x128x128xbf16, #tpu.memory_space<vmem>>, vector<1x128x128xbf16>
    %55 = vector.shape_cast %54 : vector<1x128x128xbf16> to vector<128x128xbf16>
    %cst_29 = arith.constant dense<0.000000e+00> : vector<64x128xf32>
    %56 = tpu.matmul %53, %55, %cst_29 {dimension_numbers = #tpu.dot_dimension_numbers<[1], [0], [0], [1], [0, 0, 1, 1], [], []>} : vector<64x128xbf16>, vector<128x128xbf16>, vector<64x128xf32> -> vector<64x128xf32>
    %57 = arith.truncf %56 : vector<64x128xf32> to vector<64x128xbf16>
    %cst_30 = arith.constant dense<0.000000e+00> : vector<64x128xf32>
    %58 = tpu.matmul %0, %57, %cst_30 {dimension_numbers = #tpu.dot_dimension_numbers<[1], [0], [0], [1], [0, 0, 1, 1], [], []>} : vector<64x64xbf16>, vector<64x128xbf16>, vector<64x128xf32> -> vector<64x128xf32>
    %c3_31 = arith.constant 3 : index
    %c0_32 = arith.constant 0 : index
    %59 = vector.load %arg3[%c3_31, %c0_32] : memref<4x128xf32, #tpu.memory_space<vmem>>, vector<1x128xf32>
    %60 = vector.shape_cast %59 : vector<1x128xf32> to vector<128xf32>
    %61 = vector.shape_cast %60 : vector<128xf32> to vector<1x128xf32>
    %62 = vector.broadcast %61 : vector<1x128xf32> to vector<64x128xf32>
    %63 = arith.addf %58, %62 : vector<64x128xf32>
    %c0_33 = arith.constant 0 : index
    %c0_34 = arith.constant 0 : index
    %64 = vector.load %arg4[%c0_33, %c0_34] : memref<64x128xf32, #tpu.memory_space<vmem>>, vector<64x128xf32>
    tpu.vector_store %arg4[%c0_33, %c0_34], %63 {strides = array<i32>} : memref<64x128xf32, #tpu.memory_space<vmem>>, vector<64x128xf32>,
    return
  }
}

</mosaic_0001>

<bundles_post_ra>
// kernel: gnn_forward.1
= control target key start
LH: loop header
LB: loop body
LE: loop exit
PB: predicated region body
PF: predicated region fallthrough
CT: control target
= control target key end

     0   :  { %vm157_vm0 = vcmask 523264   ;;  %s1283_s2 = inlined_call_operand.vmem [shape: bf16[4,128,128], index: 2, kind: input, shape index: {}]   ;;  %s1284_s1 = inlined_call_operand.vmem [shape: f32[64,128], index: 1, kind: input, shape index: {}]   ;;  %s1285_s3 = inlined_call_operand.vmem [shape: f32[4,128], index: 3, kind: input, shape index: {}]   ;;  %s1286_s0 = inlined_call_operand.vmem [shape: bf16[64,64], index: 0, kind: input, shape index: {}]   ;;  %s1287_s4 = inlined_call_operand.vmem [shape: f32[64,128], index: 4, kind: output, shape index: {}]  }
   0x1   :  { %v925_v0 = vld [vmem:[%s1283_s2 + $0x38] sm:$0xff]  ;;  %v924_v1 = vld [vmem:[%s1283_s2 + $0x30] sm:$0xff]  ;;  %v923_v2 = vld [vmem:[%s1283_s2 + $0x28] sm:$0xff] }
   0x2   :  { %102 = vmatpush.bf16.msra.mxu0 %v925_v0  ;;  %v922_v3 = vld [vmem:[%s1283_s2 + $0x20] sm:$0xff]  ;;  %v921_v4 = vld [vmem:[%s1283_s2 + $0x18] sm:$0xff]  ;;  %v920_v5 = vld [vmem:[%s1283_s2 + $0x10] sm:$0xff] }
   0x3   :  { %v919_v6 = vld [vmem:[%s1283_s2 + $0x8] sm:$0xff]  ;;  %v918_v7 = vld [vmem:[%s1283_s2] sm:$0xff]  ;;  %v1018_v11 = vld [vmem:[%s1284_s1 + $0x10] sm:$0xff] }
   0x4   :  { %v1006_v8 = vld [vmem:[%s1284_s1] sm:$0xff]  ;;  %v1011_v9 = vld [vmem:[%s1284_s1 + $0x8] sm:$0xff]  ;;  %v1023_v12 = vld [vmem:[%s1284_s1 + $0x18] sm:$0xff] }
   0x5   :  { %v34_v10 = vpack.c.bf16 %v1011_v9, %v1006_v8  ;;  %v35_v13 = vpack.c.bf16 %v1023_v12, %v1018_v11  ;;  %v1030_v14 = vld [vmem:[%s1284_s1 + $0x20] sm:$0xff]  ;;  %v1035_v15 = vld [vmem:[%s1284_s1 + $0x28] sm:$0xff]  ;;  %v1042_v17 = vld [vmem:[%s1284_s1 + $0x30] sm:$0xff] }
   0x6   :  { %103 = vmatpush.bf16.msra.mxu0 %v924_v1  ;;  %v36_v16 = vpack.c.bf16 %v1035_v15, %v1030_v14  ;;  %v1047_v18 = vld [vmem:[%s1284_s1 + $0x38] sm:$0xff]  ;;  %v1054_v32 = vld [vmem:[%s1286_s0] sm:$0xff]  ;;  %v1061_v33 = vld [vmem:[%s1286_s0 + $0x8] sm:$0xff] }
   0x7   :  { %v37_v19 = vpack.c.bf16 %v1047_v18, %v1042_v17  ;;  %v933_v34 = vld [vmem:[%s1283_s2 + $0x78] sm:$0xff]  ;;  %v932_v35 = vld [vmem:[%s1283_s2 + $0x70] sm:$0xff]  ;;  %v931_v36 = vld [vmem:[%s1283_s2 + $0x68] sm:$0xff] }
   0x8   :  { %300 = vmatpush.bf16.msra.mxu2 %v933_v34  ;;  %v930_v37 = vld [vmem:[%s1283_s2 + $0x60] sm:$0xff]  ;;  %v1080_v38 = vld [vmem:[%s1286_s0 + $0x10] sm:$0xff]  ;;  %v1087_v39 = vld [vmem:[%s1286_s0 + $0x18] sm:$0xff] }
   0x9   :  { %v929_v40 = vld [vmem:[%s1283_s2 + $0x58] sm:$0xff]  ;;  %v928_v41 = vld [vmem:[%s1283_s2 + $0x50] sm:$0xff]  ;;  %v927_v42 = vld [vmem:[%s1283_s2 + $0x48] sm:$0xff] }
   0xa   :  { %104 = vmatpush.bf16.msra.mxu0 %v923_v2  ;;  %v926_v43 = vld [vmem:[%s1283_s2 + $0x40] sm:$0xff] }
   0xb   :  { %v950_v44 = vld [vmem:[%s1285_s3] ss:$0 sm:$0xff] }
   0xc   :  { %301 = vmatpush.bf16.msra.mxu2 %v932_v35 }
   0xe   :  { %105 = vmatpush.bf16.msra.mxu0 %v922_v3 }
  0x10   :  { %302 = vmatpush.bf16.msra.mxu2 %v931_v36 }
  0x12   :  { %106 = vmatpush.bf16.msra.mxu0 %v921_v4 }
  0x14   :  { %303 = vmatpush.bf16.msra.mxu2 %v930_v37 }
  0x16   :  { %107 = vmatpush.bf16.msra.mxu0 %v920_v5 }
  0x18   :  { %304 = vmatpush.bf16.msra.mxu2 %v929_v40 }
  0x1a   :  { %108 = vmatpush.bf16.msra.mxu0 %v919_v6 }
  0x1c   :  { %305 = vmatpush.bf16.msra.mxu2 %v928_v41  ;;  %v941_v41 = vld [vmem:[%s1283_s2 + $0xb8] sm:$0xff] }
  0x1e   :  { %109 = vmatpush.bf16.msra.mxu0 %v918_v7 }
  0x20   :  { %306 = vmatpush.bf16.msra.mxu2 %v927_v42  ;;  %v940_v42 = vld [vmem:[%s1283_s2 + $0xb0] sm:$0xff] }
  0x21   :  { %110 = vmatmul.bf16.vlgmr.msra.gmra.mxu0 %v34_v10 }
  0x24   :  { %307 = vmatpush.bf16.msra.mxu2 %v926_v43  ;;  %v939_v43 = vld [vmem:[%s1283_s2 + $0xa8] sm:$0xff] }
  0x31   :  { %115 = vmatmul.bf16.gmra.mxu0 %v35_v13 }
  0x41   :  { %120 = vmatmul.bf16.gmra.mxu0 %v36_v16 }
  0x51   :  { %125 = vmatmul.bf16.gmra.mxu0 %v37_v19 }
  0x9e   :  { %v111_v20 = vpop.f32.mrf.mxu0 }
  0xa6   :  { %v113_v21 = vpop.f32.mrf.mxu0 }
  0xa7   :  { %v131_v31 = vpack.c.bf16 %v113_v21, %v111_v20 }
  0xae   :  { %v116_v22 = vpop.f32.mrf.mxu0 }
  0xb6   :  { %v118_v23 = vpop.f32.mrf.mxu0 }
  0xb7   :  { %v132_v30 = vpack.c.bf16 %v118_v23, %v116_v22 }
  0xbe   :  { %v121_v24 = vpop.f32.mrf.mxu0 }
  0xc6   :  { %v123_v25 = vpop.f32.mrf.mxu0 }
  0xc7   :  { %v133_v29 = vpack.c.bf16 %v123_v25, %v121_v24 }
  0xce   :  { %v126_v26 = vpop.f32.mrf.mxu0 }
  0xd6   :  { %v128_v27 = vpop.f32.mrf.mxu0 }
  0xd7   :  { %v134_v28 = vpack.c.bf16 %v128_v27, %v126_v26 }
  0xd9   :  { %174 = vmatpush.bf16.msra.mxu1 %v134_v28 }
  0xdd   :  { %175 = vmatpush.bf16.msra.mxu1 %v133_v29 }
  0xe1   :  { %176 = vmatpush.bf16.msra.mxu1 %v132_v30 }
  0xe5   :  { %177 = vmatpush.bf16.msra.mxu1 %v131_v31 }
  0xe8   :  { %754 = vmatmul.msk.bf16.vlgmr.msra.gmra.mxu1 %vm157_vm0, %v1054_v32 }
  0xe9   :  { %465 = vmatpush.bf16.msrb.mxu1 %v941_v41 }
  0xed   :  { %466 = vmatpush.bf16.msrb.mxu1 %v940_v42 }
  0xf1   :  { %467 = vmatpush.bf16.msrb.mxu1 %v939_v43 }
  0xf8   :  { %755 = vmatmul.msk.bf16.gmra.mxu1 %vm157_vm0, %v1061_v33 }
 0x108   :  { %756 = vmatmul.msk.bf16.gmra.mxu1 %vm157_vm0, %v1080_v38 }
 0x118   :  { %757 = vmatmul.msk.bf16.gmra.mxu1 %vm157_vm0, %v1087_v39 }
 0x165   :  { %v179_v45 = vpop.f32.mrf.mxu1 }
 0x166   :  { %v180_v46 = vadd.f32 %v950_v44, %v179_v45  ;;  %v937_v45 = vld [vmem:[%s1283_s2 + $0x98] sm:$0xff] }
 0x168   :  { %v207_v47 = vmul.f32 0.01, %v180_v46  ;;  %vm199_vm1 = vcmp.ge.f32.partialorder %v180_v46, 0.0 }
 0x16a   :  { %v215_v51 = vsel %vm199_vm1, %v180_v46, %v207_v47  ;;  %v936_v46 = vld [vmem:[%s1283_s2 + $0x90] sm:$0xff]  ;;  %v935_v47 = vld [vmem:[%s1283_s2 + $0x88] sm:$0xff] }
 0x16b   :  { %v1107_v53 = vadd.f32 %v215_v51, %v1006_v8 }
 0x16d   :  { %v181_v48 = vpop.f32.mrf.mxu1 }
 0x16e   :  { %v182_v49 = vadd.f32 %v950_v44, %v181_v48  ;;  %v934_v48 = vld [vmem:[%s1283_s2 + $0x80] sm:$0xff] }
 0x170   :  { %vm200_vm2 = vcmp.ge.f32.partialorder %v182_v49, 0.0  ;;  %v208_v50 = vmul.f32 0.01, %v182_v49 }
 0x172   :  { %v216_v52 = vsel %vm200_vm2, %v182_v49, %v208_v50  ;;  %v951_v49 = vld [vmem:[%s1285_s3 + $0x1] ss:$0 sm:$0xff] }
 0x173   :  { %v1110_v54 = vadd.f32 %v216_v52, %v1011_v9 }
 0x175   :  { %v184_v55 = vpop.f32.mrf.mxu1  ;;  %v231_v56 = vpack.c.bf16 %v1110_v54, %v1107_v53 }
 0x176   :  { %v185_v57 = vadd.f32 %v950_v44, %v184_v55 }
 0x177   :  { %308 = vmatmul.bf16.vlgmr.msra.gmra.mxu2 %v231_v56 }
 0x178   :  { %v209_v58 = vmul.f32 0.01, %v185_v57  ;;  %vm201_vm3 = vcmp.ge.f32.partialorder %v185_v57, 0.0 }
 0x17a   :  { %v217_v62 = vsel %vm201_vm3, %v185_v57, %v209_v58 }
 0x17b   :  { %v1115_v0 = vadd.f32 %v217_v62, %v1018_v11 }
 0x17d   :  { %v186_v59 = vpop.f32.mrf.mxu1 }
 0x17e   :  { %v187_v60 = vadd.f32 %v950_v44, %v186_v59 }
 0x180   :  { %vm202_vm4 = vcmp.ge.f32.partialorder %v187_v60, 0.0  ;;  %v210_v61 = vmul.f32 0.01, %v187_v60 }
 0x182   :  { %v218_v63 = vsel %vm202_vm4, %v187_v60, %v210_v61 }
 0x183   :  { %v1118_v1 = vadd.f32 %v218_v63, %v1023_v12 }
 0x185   :  { %v189_v2 = vpop.f32.mrf.mxu1  ;;  %v232_v3 = vpack.c.bf16 %v1118_v1, %v1115_v0 }
 0x186   :  { %v190_v4 = vadd.f32 %v950_v44, %v189_v2 }
 0x187   :  { %313 = vmatmul.bf16.gmra.mxu2 %v232_v3 }
 0x188   :  { %v211_v5 = vmul.f32 0.01, %v190_v4  ;;  %vm203_vm5 = vcmp.ge.f32.partialorder %v190_v4, 0.0 }
 0x18a   :  { %v219_v9 = vsel %vm203_vm5, %v190_v4, %v211_v5 }
 0x18b   :  { %v1123_v11 = vadd.f32 %v219_v9, %v1030_v14 }
 0x18d   :  { %v191_v6 = vpop.f32.mrf.mxu1 }
 0x18e   :  { %v192_v7 = vadd.f32 %v950_v44, %v191_v6 }
 0x190   :  { %vm204_vm6 = vcmp.ge.f32.partialorder %v192_v7, 0.0  ;;  %v212_v8 = vmul.f32 0.01, %v192_v7 }
 0x192   :  { %v220_v10 = vsel %vm204_vm6, %v192_v7, %v212_v8 }
 0x193   :  { %v1126_v12 = vadd.f32 %v220_v10, %v1035_v15 }
 0x195   :  { %v194_v13 = vpop.f32.mrf.mxu1  ;;  %v233_v16 = vpack.c.bf16 %v1126_v12, %v1123_v11 }
 0x196   :  { %v195_v19 = vadd.f32 %v950_v44, %v194_v13 }
 0x197   :  { %318 = vmatmul.bf16.gmra.mxu2 %v233_v16 }
 0x198   :  { %v213_v20 = vmul.f32 0.01, %v195_v19  ;;  %vm205_vm7 = vcmp.ge.f32.partialorder %v195_v19, 0.0 }
 0x19a   :  { %v221_v24 = vsel %vm205_vm7, %v195_v19, %v213_v20 }
 0x19b   :  { %v1131_v14 = vadd.f32 %v221_v24, %v1042_v17 }
 0x19d   :  { %v196_v21 = vpop.f32.mrf.mxu1 }
 0x19e   :  { %v197_v22 = vadd.f32 %v950_v44, %v196_v21  ;;  %v938_v44 = vld [vmem:[%s1283_s2 + $0xa0] sm:$0xff] }
 0x19f   :  { %468 = vmatpush.bf16.msrb.mxu1 %v938_v44 }
 0x1a0   :  { %vm206_vm8 = vcmp.ge.f32.partialorder %v197_v22, 0.0  ;;  %v214_v23 = vmul.f32 0.01, %v197_v22 }
 0x1a2   :  { %v222_v25 = vsel %vm206_vm8, %v197_v22, %v214_v23 }
 0x1a3   :  { %v1134_v15 = vadd.f32 %v222_v25, %v1047_v18  ;;  %469 = vmatpush.bf16.msrb.mxu1 %v937_v45 }
 0x1a5   :  { %v234_v26 = vpack.c.bf16 %v1134_v15, %v1131_v14 }
 0x1a7   :  { %323 = vmatmul.bf16.gmra.mxu2 %v234_v26  ;;  %470 = vmatpush.bf16.msrb.mxu1 %v936_v46  ;;  %v949_v46 = vld [vmem:[%s1283_s2 + $0xf8] sm:$0xff] }
 0x1a8   :  { %630 = vmatpush.bf16.msrb.mxu0 %v949_v46 }
 0x1ab   :  { %471 = vmatpush.bf16.msrb.mxu1 %v935_v47  ;;  %v948_v47 = vld [vmem:[%s1283_s2 + $0xf0] sm:$0xff] }
 0x1ac   :  { %631 = vmatpush.bf16.msrb.mxu0 %v948_v47 }
 0x1af   :  { %472 = vmatpush.bf16.msrb.mxu1 %v934_v48  ;;  %v947_v48 = vld [vmem:[%s1283_s2 + $0xe8] sm:$0xff] }
 0x1b0   :  { %632 = vmatpush.bf16.msrb.mxu0 %v947_v48 }
 0x1fa   :  { %v309_v27 = vpop.f32.mrf.mxu2 }
 0x202   :  { %v311_v28 = vpop.f32.mrf.mxu2 }
 0x203   :  { %v329_v18 = vpack.c.bf16 %v311_v28, %v309_v27 }
 0x20a   :  { %v314_v29 = vpop.f32.mrf.mxu2 }
 0x212   :  { %v316_v30 = vpop.f32.mrf.mxu2 }
 0x213   :  { %v330_v17 = vpack.c.bf16 %v316_v30, %v314_v29 }
 0x21a   :  { %v319_v31 = vpop.f32.mrf.mxu2 }
 0x222   :  { %v321_v34 = vpop.f32.mrf.mxu2 }
 0x223   :  { %v331_v40 = vpack.c.bf16 %v321_v34, %v319_v31 }
 0x22a   :  { %v324_v35 = vpop.f32.mrf.mxu2 }
 0x232   :  { %v326_v36 = vpop.f32.mrf.mxu2 }
 0x233   :  { %v332_v37 = vpack.c.bf16 %v326_v36, %v324_v35 }
 0x235   :  { %339 = vmatpush.bf16.msra.mxu3 %v332_v37 }
 0x239   :  { %340 = vmatpush.bf16.msra.mxu3 %v331_v40 }
 0x23d   :  { %341 = vmatpush.bf16.msra.mxu3 %v330_v17 }
 0x241   :  { %342 = vmatpush.bf16.msra.mxu3 %v329_v18 }
 0x244   :  { %806 = vmatmul.msk.bf16.vlgmr.msra.gmra.mxu3 %vm157_vm0, %v1054_v32 }
 0x254   :  { %807 = vmatmul.msk.bf16.gmra.mxu3 %vm157_vm0, %v1061_v33 }
 0x264   :  { %808 = vmatmul.msk.bf16.gmra.mxu3 %vm157_vm0, %v1080_v38 }
 0x274   :  { %809 = vmatmul.msk.bf16.gmra.mxu3 %vm157_vm0, %v1087_v39 }
 0x2c7   :  { %v344_v50 = vpop.f32.mrf.mxu3 }
 0x2c8   :  { %v345_v51 = vadd.f32 %v951_v49, %v344_v50  ;;  %v945_v50 = vld [vmem:[%s1283_s2 + $0xd8] sm:$0xff] }
 0x2ca   :  { %v372_v52 = vmul.f32 0.01, %v345_v51  ;;  %vm364_vm9 = vcmp.ge.f32.partialorder %v345_v51, 0.0 }
 0x2cc   :  { %v380_v57 = vsel %vm364_vm9, %v345_v51, %v372_v52  ;;  %v944_v51 = vld [vmem:[%s1283_s2 + $0xd0] sm:$0xff]  ;;  %v943_v52 = vld [vmem:[%s1283_s2 + $0xc8] sm:$0xff] }
 0x2cd   :  { %v1174_v60 = vadd.f32 %v380_v57, %v1107_v53 }
 0x2cf   :  { %v346_v55 = vpop.f32.mrf.mxu3 }
 0x2d0   :  { %v347_v56 = vadd.f32 %v951_v49, %v346_v55  ;;  %v942_v55 = vld [vmem:[%s1283_s2 + $0xc0] sm:$0xff] }
 0x2d2   :  { %vm365_vm10 = vcmp.ge.f32.partialorder %v347_v56, 0.0  ;;  %v373_v58 = vmul.f32 0.01, %v347_v56 }
 0x2d4   :  { %v381_v59 = vsel %vm365_vm10, %v347_v56, %v373_v58  ;;  %v952_v56 = vld [vmem:[%s1285_s3 + $0x2] ss:$0 sm:$0xff] }
 0x2d5   :  { %v1177_v61 = vadd.f32 %v381_v59, %v1110_v54 }
 0x2d7   :  { %v349_v62 = vpop.f32.mrf.mxu3  ;;  %v396_v63 = vpack.c.bf16 %v1177_v61, %v1174_v60 }
 0x2d8   :  { %v350_v2 = vadd.f32 %v951_v49, %v349_v62 }
 0x2d9   :  { %473 = vmatmul.bf16.vlgmr.msrb.gmra.mxu1 %v396_v63 }
 0x2da   :  { %v374_v3 = vmul.f32 0.01, %v350_v2  ;;  %vm366_vm11 = vcmp.ge.f32.partialorder %v350_v2, 0.0 }
 0x2dc   :  { %v382_v7 = vsel %vm366_vm11, %v350_v2, %v374_v3 }
 0x2dd   :  { %v1182_v53 = vadd.f32 %v382_v7, %v1115_v0 }
 0x2df   :  { %v351_v4 = vpop.f32.mrf.mxu3 }
 0x2e0   :  { %v352_v5 = vadd.f32 %v951_v49, %v351_v4 }
 0x2e2   :  { %vm367_vm12 = vcmp.ge.f32.partialorder %v352_v5, 0.0  ;;  %v375_v6 = vmul.f32 0.01, %v352_v5 }
 0x2e4   :  { %v383_v8 = vsel %vm367_vm12, %v352_v5, %v375_v6 }
 0x2e5   :  { %v1185_v54 = vadd.f32 %v383_v8, %v1118_v1 }
 0x2e7   :  { %v354_v9 = vpop.f32.mrf.mxu3  ;;  %v397_v10 = vpack.c.bf16 %v1185_v54, %v1182_v53 }
 0x2e8   :  { %v355_v13 = vadd.f32 %v951_v49, %v354_v9 }
 0x2e9   :  { %478 = vmatmul.bf16.gmra.mxu1 %v397_v10 }
 0x2ea   :  { %v376_v16 = vmul.f32 0.01, %v355_v13  ;;  %vm368_vm13 = vcmp.ge.f32.partialorder %v355_v13, 0.0 }
 0x2ec   :  { %v384_v22 = vsel %vm368_vm13, %v355_v13, %v376_v16 }
 0x2ed   :  { %v1190_v0 = vadd.f32 %v384_v22, %v1123_v11 }
 0x2ef   :  { %v356_v19 = vpop.f32.mrf.mxu3 }
 0x2f0   :  { %v357_v20 = vadd.f32 %v951_v49, %v356_v19 }
 0x2f2   :  { %vm369_vm14 = vcmp.ge.f32.partialorder %v357_v20, 0.0  ;;  %v377_v21 = vmul.f32 0.01, %v357_v20 }
 0x2f4   :  { %v385_v23 = vsel %vm369_vm14, %v357_v20, %v377_v21 }
 0x2f5   :  { %v1193_v1 = vadd.f32 %v385_v23, %v1126_v12 }
 0x2f7   :  { %v359_v24 = vpop.f32.mrf.mxu3  ;;  %v398_v25 = vpack.c.bf16 %v1193_v1, %v1190_v0 }
 0x2f8   :  { %v360_v26 = vadd.f32 %v951_v49, %v359_v24 }
 0x2f9   :  { %483 = vmatmul.bf16.gmra.mxu1 %v398_v25 }
 0x2fa   :  { %v378_v27 = vmul.f32 0.01, %v360_v26  ;;  %vm370_vm15 = vcmp.ge.f32.partialorder %v360_v26, 0.0 }
 0x2fc   :  { %v386_v31 = vsel %vm370_vm15, %v360_v26, %v378_v27 }
 0x2fd   :  { %v1198_v11 = vadd.f32 %v386_v31, %v1131_v14 }
 0x2ff   :  { %v361_v28 = vpop.f32.mrf.mxu3 }
 0x300   :  { %v362_v29 = vadd.f32 %v951_v49, %v361_v28  ;;  %v946_v49 = vld [vmem:[%s1283_s2 + $0xe0] sm:$0xff] }
 0x301   :  { %633 = vmatpush.bf16.msrb.mxu0 %v946_v49 }
 0x302   :  { %vm371_vm1 = vcmp.ge.f32.partialorder %v362_v29, 0.0  ;;  %v379_v30 = vmul.f32 0.01, %v362_v29 }
 0x304   :  { %v387_v34 = vsel %vm371_vm1, %v362_v29, %v379_v30 }
 0x305   :  { %v1201_v12 = vadd.f32 %v387_v34, %v1134_v15  ;;  %634 = vmatpush.bf16.msrb.mxu0 %v945_v50 }
 0x307   :  { %v399_v35 = vpack.c.bf16 %v1201_v12, %v1198_v11 }
 0x309   :  { %488 = vmatmul.bf16.gmra.mxu1 %v399_v35  ;;  %635 = vmatpush.bf16.msrb.mxu0 %v944_v51 }
 0x30d   :  { %636 = vmatpush.bf16.msrb.mxu0 %v943_v52 }
 0x311   :  { %637 = vmatpush.bf16.msrb.mxu0 %v942_v55 }
 0x356   :  { %v474_v36 = vpop.f32.mrf.mxu1 }
 0x35e   :  { %v476_v37 = vpop.f32.mrf.mxu1 }
 0x35f   :  { %v494_v15 = vpack.c.bf16 %v476_v37, %v474_v36 }
 0x366   :  { %v479_v40 = vpop.f32.mrf.mxu1 }
 0x36e   :  { %v481_v17 = vpop.f32.mrf.mxu1 }
 0x36f   :  { %v495_v14 = vpack.c.bf16 %v481_v17, %v479_v40 }
 0x376   :  { %v484_v18 = vpop.f32.mrf.mxu1 }
 0x37e   :  { %v486_v41 = vpop.f32.mrf.mxu1 }
 0x37f   :  { %v496_v45 = vpack.c.bf16 %v486_v41, %v484_v18 }
 0x386   :  { %v489_v42 = vpop.f32.mrf.mxu1 }
 0x38e   :  { %v491_v43 = vpop.f32.mrf.mxu1 }
 0x38f   :  { %v497_v44 = vpack.c.bf16 %v491_v43, %v489_v42 }
 0x391   :  { %504 = vmatpush.bf16.msrb.mxu3 %v497_v44 }
 0x395   :  { %505 = vmatpush.bf16.msrb.mxu3 %v496_v45 }
 0x399   :  { %506 = vmatpush.bf16.msrb.mxu3 %v495_v14 }
 0x39d   :  { %507 = vmatpush.bf16.msrb.mxu3 %v494_v15 }
 0x3a0   :  { %858 = vmatmul.msk.bf16.vlgmr.msrb.gmra.mxu3 %vm157_vm0, %v1054_v32 }
 0x3b0   :  { %859 = vmatmul.msk.bf16.gmra.mxu3 %vm157_vm0, %v1061_v33 }
 0x3c0   :  { %860 = vmatmul.msk.bf16.gmra.mxu3 %vm157_vm0, %v1080_v38 }
 0x3d0   :  { %861 = vmatmul.msk.bf16.gmra.mxu3 %vm157_vm0, %v1087_v39 }
 0x423   :  { %v509_v57 = vpop.f32.mrf.mxu3 }
 0x424   :  { %v510_v58 = vadd.f32 %v952_v56, %v509_v57 }
 0x426   :  { %v537_v59 = vmul.f32 0.01, %v510_v58  ;;  %vm529_vm2 = vcmp.ge.f32.partialorder %v510_v58, 0.0 }
 0x428   :  { %v545_v2 = vsel %vm529_vm2, %v510_v58, %v537_v59 }
 0x429   :  { %v553_v5 = vadd.f32 %v545_v2, %v1174_v60 }
 0x42b   :  { %v511_v62 = vpop.f32.mrf.mxu3 }
 0x42c   :  { %v512_v63 = vadd.f32 %v952_v56, %v511_v62 }
 0x42e   :  { %vm530_vm3 = vcmp.ge.f32.partialorder %v512_v63, 0.0  ;;  %v538_v3 = vmul.f32 0.01, %v512_v63 }
 0x430   :  { %v546_v4 = vsel %vm530_vm3, %v512_v63, %v538_v3 }
 0x431   :  { %v554_v6 = vadd.f32 %v546_v4, %v1177_v61 }
 0x433   :  { %v514_v7 = vpop.f32.mrf.mxu3  ;;  %v561_v8 = vpack.c.bf16 %v554_v6, %v553_v5 }
 0x434   :  { %v515_v9 = vadd.f32 %v952_v56, %v514_v7 }
 0x435   :  { %638 = vmatmul.bf16.vlgmr.msrb.gmra.mxu0 %v561_v8 }
 0x436   :  { %v539_v10 = vmul.f32 0.01, %v515_v9  ;;  %vm531_vm4 = vcmp.ge.f32.partialorder %v515_v9, 0.0 }
 0x438   :  { %v547_v20 = vsel %vm531_vm4, %v515_v9, %v539_v10 }
 0x439   :  { %v555_v22 = vadd.f32 %v547_v20, %v1182_v53 }
 0x43b   :  { %v516_v13 = vpop.f32.mrf.mxu3 }
 0x43c   :  { %v517_v16 = vadd.f32 %v952_v56, %v516_v13 }
 0x43e   :  { %vm532_vm5 = vcmp.ge.f32.partialorder %v517_v16, 0.0  ;;  %v540_v19 = vmul.f32 0.01, %v517_v16 }
 0x440   :  { %v548_v21 = vsel %vm532_vm5, %v517_v16, %v540_v19 }
 0x441   :  { %v556_v23 = vadd.f32 %v548_v21, %v1185_v54 }
 0x443   :  { %v519_v24 = vpop.f32.mrf.mxu3  ;;  %v562_v60 = vpack.c.bf16 %v556_v23, %v555_v22 }
 0x444   :  { %v520_v61 = vadd.f32 %v952_v56, %v519_v24 }
 0x445   :  { %643 = vmatmul.bf16.gmra.mxu0 %v562_v60 }
 0x446   :  { %v541_v25 = vmul.f32 0.01, %v520_v61  ;;  %vm533_vm6 = vcmp.ge.f32.partialorder %v520_v61, 0.0 }
 0x448   :  { %v549_v29 = vsel %vm533_vm6, %v520_v61, %v541_v25 }
 0x449   :  { %v557_v31 = vadd.f32 %v549_v29, %v1190_v0 }
 0x44b   :  { %v521_v26 = vpop.f32.mrf.mxu3 }
 0x44c   :  { %v522_v27 = vadd.f32 %v952_v56, %v521_v26 }
 0x44e   :  { %vm534_vm7 = vcmp.ge.f32.partialorder %v522_v27, 0.0  ;;  %v542_v28 = vmul.f32 0.01, %v522_v27 }
 0x450   :  { %v550_v30 = vsel %vm534_vm7, %v522_v27, %v542_v28 }
 0x451   :  { %v558_v34 = vadd.f32 %v550_v30, %v1193_v1 }
 0x453   :  { %v524_v35 = vpop.f32.mrf.mxu3  ;;  %v563_v53 = vpack.c.bf16 %v558_v34, %v557_v31 }
 0x454   :  { %v525_v54 = vadd.f32 %v952_v56, %v524_v35 }
 0x455   :  { %648 = vmatmul.bf16.gmra.mxu0 %v563_v53 }
 0x456   :  { %v543_v36 = vmul.f32 0.01, %v525_v54  ;;  %vm535_vm8 = vcmp.ge.f32.partialorder %v525_v54, 0.0 }
 0x458   :  { %v551_v18 = vsel %vm535_vm8, %v525_v54, %v543_v36 }
 0x459   :  { %v559_v42 = vadd.f32 %v551_v18, %v1198_v11  ;;  %v953_v11 = vld [vmem:[%s1285_s3 + $0x3] ss:$0 sm:$0xff] }
 0x45b   :  { %v526_v37 = vpop.f32.mrf.mxu3 }
 0x45c   :  { %v527_v40 = vadd.f32 %v952_v56, %v526_v37 }
 0x45e   :  { %vm536_vm9 = vcmp.ge.f32.partialorder %v527_v40, 0.0  ;;  %v544_v17 = vmul.f32 0.01, %v527_v40 }
 0x460   :  { %v552_v41 = vsel %vm536_vm9, %v527_v40, %v544_v17 }
 0x461   :  { %v560_v43 = vadd.f32 %v552_v41, %v1201_v12 }
 0x463   :  { %v564_v44 = vpack.c.bf16 %v560_v43, %v559_v42 }
 0x465   :  { %653 = vmatmul.bf16.gmra.mxu0 %v564_v44 }
 0x4b2   :  { %v639_v0 = vpop.f32.mrf.mxu0 }
 0x4ba   :  { %v641_v1 = vpop.f32.mrf.mxu0 }
 0x4bb   :  { %v659_v52 = vpack.c.bf16 %v641_v1, %v639_v0 }
 0x4c2   :  { %v644_v45 = vpop.f32.mrf.mxu0 }
 0x4ca   :  { %v646_v14 = vpop.f32.mrf.mxu0 }
 0x4cb   :  { %v660_v51 = vpack.c.bf16 %v646_v14, %v644_v45 }
 0x4d2   :  { %v649_v15 = vpop.f32.mrf.mxu0 }
 0x4da   :  { %v651_v46 = vpop.f32.mrf.mxu0 }
 0x4db   :  { %v661_v50 = vpack.c.bf16 %v651_v46, %v649_v15 }
 0x4e2   :  { %v654_v47 = vpop.f32.mrf.mxu0 }
 0x4ea   :  { %v656_v48 = vpop.f32.mrf.mxu0 }
 0x4eb   :  { %v662_v49 = vpack.c.bf16 %v656_v48, %v654_v47 }
 0x4ed   :  { %669 = vmatpush.bf16.msrb.mxu2 %v662_v49 }
 0x4f1   :  { %670 = vmatpush.bf16.msrb.mxu2 %v661_v50 }
 0x4f5   :  { %671 = vmatpush.bf16.msrb.mxu2 %v660_v51 }
 0x4f9   :  { %672 = vmatpush.bf16.msrb.mxu2 %v659_v52 }
 0x4fc   :  { %910 = vmatmul.msk.bf16.vlgmr.msrb.gmra.mxu2 %vm157_vm0, %v1054_v32 }
 0x50c   :  { %911 = vmatmul.msk.bf16.gmra.mxu2 %vm157_vm0, %v1061_v33 }
 0x51c   :  { %912 = vmatmul.msk.bf16.gmra.mxu2 %vm157_vm0, %v1080_v38 }
 0x52c   :  { %913 = vmatmul.msk.bf16.gmra.mxu2 %vm157_vm0, %v1087_v39 }
 0x57f   :  { %v674_v12 = vpop.f32.mrf.mxu2 }
 0x580   :  { %v675_v55 = vadd.f32 %v953_v11, %v674_v12 }
 0x582   :  { %694 = vst [vmem:[%s1287_s4] sm:$0xff] %v675_v55 }
 0x587   :  { %v676_v32 = vpop.f32.mrf.mxu2 }
 0x588   :  { %v677_v56 = vadd.f32 %v953_v11, %v676_v32 }
 0x58a   :  { %695 = vst [vmem:[%s1287_s4 + $0x8] sm:$0xff] %v677_v56 }
 0x58f   :  { %v679_v33 = vpop.f32.mrf.mxu2 }
 0x590   :  { %v680_v38 = vadd.f32 %v953_v11, %v679_v33 }
 0x592   :  { %696 = vst [vmem:[%s1287_s4 + $0x10] sm:$0xff] %v680_v38 }
 0x597   :  { %v681_v39 = vpop.f32.mrf.mxu2 }
 0x598   :  { %v682_v57 = vadd.f32 %v953_v11, %v681_v39 }
 0x59a   :  { %697 = vst [vmem:[%s1287_s4 + $0x18] sm:$0xff] %v682_v57 }
 0x59f   :  { %v684_v58 = vpop.f32.mrf.mxu2 }
 0x5a0   :  { %v685_v59 = vadd.f32 %v953_v11, %v684_v58 }
 0x5a2   :  { %698 = vst [vmem:[%s1287_s4 + $0x20] sm:$0xff] %v685_v59 }
 0x5a7   :  { %v686_v62 = vpop.f32.mrf.mxu2 }
 0x5a8   :  { %v687_v63 = vadd.f32 %v953_v11, %v686_v62 }
 0x5aa   :  { %699 = vst [vmem:[%s1287_s4 + $0x28] sm:$0xff] %v687_v63 }
 0x5af   :  { %v689_v2 = vpop.f32.mrf.mxu2 }
 0x5b0   :  { %v690_v3 = vadd.f32 %v953_v11, %v689_v2 }
 0x5b2   :  { %700 = vst [vmem:[%s1287_s4 + $0x30] sm:$0xff] %v690_v3 }
 0x5b7   :  { %v691_v4 = vpop.f32.mrf.mxu2 }
 0x5b8   :  { %v692_v5 = vadd.f32 %v953_v11, %v691_v4 }
 0x5ba   :  { %701 = vst [vmem:[%s1287_s4 + $0x38] sm:$0xff] %v692_v5 }

</bundles_post_ra>
